<compile_context>
chip_gen: v5e
topology: v5e:2x2
jax: 0.10.0
libtpu: 0.0.40
codegen_flags: <defaults>
</compile_context>

<pallas_src>
import jax
import jax.numpy as jnp
from jax.experimental import pallas as pl
from jax.experimental.pallas import tpu as pltpu


def _vq_kernel(x_ref, embed_ref, e2h_ref, q_ref, ind_ref):
    # x_ref:     [D,  TN] activation columns (positions on the lane axis)
    # embed_ref: [Kp, D ] codebook, single resident layout
    # e2h_ref:   [Kp, 1 ] 0.5 * ||e_k||^2   (phantom rows = 1e30)
    # q_ref:     [D,  TN] dequantized columns (written straight into [B, D, N])
    # ind_ref:   [1,  TN] code indices (int32), lane-dense
    x = x_ref[...]                       # [D, TN]
    e = embed_ref[...]                   # [Kp, D]
    e2h = e2h_ref[...]                   # [Kp, 1]

    # argmin_k ||x_n - e_k||^2 == argmax_k (e_k.x_n - 0.5*||e_k||^2):
    # ||x_n||^2 is constant along k and the positive 2x scale cannot change
    # the argmax, so neither is computed.
    score = jnp.dot(e, x, preferred_element_type=jnp.float32) - e2h     # [Kp, TN]

    kp, tn = score.shape
    best = jnp.max(score, axis=0, keepdims=True)                        # [1, TN]
    k_iota = jax.lax.broadcasted_iota(jnp.int32, (kp, tn), 0)           # [Kp, TN]
    # First (lowest-index) maximiser -> matches torch argmax tie-breaking.
    ind = jnp.min(jnp.where(score == best, k_iota, kp), axis=0)         # [TN] i32

    # Codebook lookup as one-hot matmul, contracting over K (dim 0 of both),
    # so the single [K, D] codebook layout serves both matmuls.
    onehot = (k_iota == ind[None, :]).astype(e.dtype)                   # [Kp, TN]
    q = jax.lax.dot_general(e, onehot, (((0,), (0,)), ((), ())),
                            preferred_element_type=jnp.float32)          # [D, TN]

    q_ref[...] = q.astype(q_ref.dtype)
    ind_ref[...] = ind[None, :]


def _default_vmem_limit(d, kp, tn):
    """Generation-aware VMEM budget (cap at 3/4 of physical per-core VMEM)."""
    x_tile = d * tn * 4
    q_tile = d * tn * 4
    ind_tile = tn * 4
    codebook = kp * d * 4
    e2_col = (kp // 8) * 8 * 128 * 4          # [Kp, 1] occupies full lane width
    intermediates = 3 * kp * tn * 4           # score + iota + onehot
    est = 2 * (x_tile + q_tile + ind_tile) + 2 * (codebook + e2_col) + intermediates
    est = int(est * 1.5) + (4 << 20)
    try:
        cap = int(pltpu.get_tpu_info().vmem_capacity_bytes) * 3 // 4
    except Exception:
        cap = 48 << 20                        # safe on v5e/v6e (128 MiB) and v7x (64 MiB)
    return max(min(est, cap), min(32 << 20, cap))


def vq_bdn(x, embed_padded, e2_half, *, tn=512, vmem_limit_bytes=None):
    """Vector-quantize x [B, D, N] against embed_padded [Kp, D].

    Returns (quantize [B, D, N] in codebook dtype, indices [B, N] int32).
    """
    b, d, n = x.shape
    kp, d2 = embed_padded.shape
    assert d2 == d

    # Position-tile size: multiple of 128 (lane-dense), ragged last tile is
    # masked by Pallas; small N falls back to a single full-extent block.
    if n <= 128 or n <= tn:
        tn_eff = n
    else:
        tn_eff = max(128, (min(tn, n) // 128) * 128)
    gn = pl.cdiv(n, tn_eff)

    if vmem_limit_bytes is None:
        vmem_limit_bytes = _default_vmem_limit(d, kp, tn_eff)

    q, ind3 = pl.pallas_call(
        _vq_kernel,
        out_shape=(
            jax.ShapeDtypeStruct((b, d, n), embed_padded.dtype),
            jax.ShapeDtypeStruct((b, 1, n), jnp.int32),
        ),
        grid_spec=pltpu.PrefetchScalarGridSpec(
            num_scalar_prefetch=0,
            grid=(b, gn),
            in_specs=[
                pl.BlockSpec((None, d, tn_eff), lambda bb, j: (bb, 0, j)),  # x tile
                pl.BlockSpec((kp, d), lambda bb, j: (0, 0)),                # codebook (resident)
                pl.BlockSpec((kp, 1), lambda bb, j: (0, 0)),                # 0.5*||e||^2 (resident)
            ],
            out_specs=[
                pl.BlockSpec((None, d, tn_eff), lambda bb, j: (bb, 0, j)),  # quantize tile
                pl.BlockSpec((None, 1, tn_eff), lambda bb, j: (bb, 0, j)),  # indices, lane-dense
            ],
        ),
        compiler_params=pltpu.CompilerParams(
            dimension_semantics=("parallel", "parallel"),
            vmem_limit_bytes=vmem_limit_bytes,
        ),
    )(x, embed_padded, e2_half)

    return q, ind3.reshape(b, n)


class VectorQuantizationJAX:
    """Eval-mode forward of VectorQuantization (codebook_dim == dim -> no projection)."""

    def __init__(self, dim, codebook_size, key, codebook_dtype=jnp.float32):
        self.dim = dim
        self.codebook_size = codebook_size
        # Deterministic synthetic codebook (kaiming-uniform style).
        # TODO(synk): kmeans init on the first training batch is training-only.
        bound = (6.0 / dim) ** 0.5
        self.embed = jax.random.uniform(
            key, (codebook_size, dim), dtype=codebook_dtype,
            minval=-bound, maxval=bound)

        # One-time layout prep: pad K to a sublane multiple; phantom codes get a
        # huge e2 so they can never win the argmax.  The 2x distance factor is
        # folded into e2_half so the kernel does a single subtract.
        kp = ((codebook_size + 7) // 8) * 8
        pad = kp - codebook_size
        self.embed_padded = jnp.pad(self.embed, ((0, pad), (0, 0)))          # [Kp, D]
        e2_half = 0.5 * jnp.sum(jnp.square(self.embed.astype(jnp.float32)),
                                axis=1, keepdims=True)                        # [K, 1]
        self.e2_half = jnp.pad(e2_half, ((0, pad), (0, 0)),
                               constant_values=1e30)                          # [Kp, 1]

    def __call__(self, x, *, tn=512):
        # x: [B, D, N]  (PyTorch "b d n" layout).  project_in/out are Identity.
        b, d, n = x.shape
        assert d == self.dim
        quantize, embed_ind = vq_bdn(x, self.embed_padded, self.e2_half, tn=tn)
        loss = jnp.zeros((1,), dtype=jnp.float32)      # eval mode
        # TODO(synk): training-path EMA updates / commitment loss / straight-through.
        return quantize, embed_ind, loss


if __name__ == "__main__":
    key = jax.random.PRNGKey(0)
    k_x, k_e = jax.random.split(key)

    B, D, N = 2, 32, 16
    CODEBOOK_SIZE = 64

    x = jax.random.normal(k_x, (B, D, N), dtype=jnp.float32)

    vq = VectorQuantizationJAX(dim=D, codebook_size=CODEBOOK_SIZE, key=k_e)
    quantize, embed_ind, loss = vq(x)
    jax.block_until_ready((quantize, embed_ind, loss))

    # Pure-JAX reference of the eval forward (full-distance argmin, PyTorch math).
    e = vq.embed
    x_flat = jnp.transpose(x, (0, 2, 1)).reshape(B * N, D)
    dist = -(jnp.sum(x_flat**2, axis=1, keepdims=True)
             - 2.0 * (x_flat @ e.T)
             + jnp.sum(e**2, axis=1)[None, :])
    ref_ind = jnp.argmax(dist, axis=-1).reshape(B, N)
    ref_q = jnp.transpose(e[ref_ind], (0, 2, 1))

    assert quantize.shape == (B, D, N)
    assert embed_ind.shape == (B, N)
    assert loss.shape == (1,)
    assert int(jnp.sum(embed_ind != ref_ind)) == 0
    assert bool(jnp.allclose(quantize, ref_q, atol=1e-5))

    print("KERNEL_OK")
</pallas_src>

<mosaic_0001>
module attributes {stable_mosaic.version = 11 : i64} {
  func.func @_vq_kernel(%arg0: i32, %arg1: i32, %arg2: memref<1x32x16xf32, #tpu.memory_space<vmem>>, %arg3: memref<64x32xf32, #tpu.memory_space<vmem>>, %arg4: memref<64x1xf32, #tpu.memory_space<vmem>>, %arg5: memref<1x32x16xf32, #tpu.memory_space<vmem>>, %arg6: memref<1x1x16xi32, #tpu.memory_space<vmem>>) attributes {dimension_semantics = [#tpu.dimension_semantics<parallel>, #tpu.dimension_semantics<parallel>], iteration_bounds = array<i64: 2, 1>, scalar_prefetch = 0 : i64, scratch_operands = 0 : i64, tpu.core_type = #tpu.core_type<tc>, window_params = [{transform_indices = @transform_0, window_bounds = array<i64: 1, 32, 16>}, {pipeline_mode = #tpu.pipeline_mode<synchronous>, transform_indices = @transform_1, window_bounds = array<i64: 64, 32>}, {pipeline_mode = #tpu.pipeline_mode<synchronous>, transform_indices = @transform_2, window_bounds = array<i64: 64, 1>}, {transform_indices = @transform_3, window_bounds = array<i64: 1, 32, 16>}, {transform_indices = @transform_4, window_bounds = array<i64: 1, 1, 16>}]} {
    %c0 = arith.constant 0 : index
    %c0_0 = arith.constant 0 : index
    %c0_1 = arith.constant 0 : index
    %0 = vector.load %arg2[%c0, %c0_0, %c0_1] : memref<1x32x16xf32, #tpu.memory_space<vmem>>, vector<1x32x16xf32>
    %1 = vector.shape_cast %0 : vector<1x32x16xf32> to vector<32x16xf32>
    %c0_2 = arith.constant 0 : index
    %c0_3 = arith.constant 0 : index
    %2 = vector.load %arg3[%c0_2, %c0_3] : memref<64x32xf32, #tpu.memory_space<vmem>>, vector<64x32xf32>
    %c0_4 = arith.constant 0 : index
    %c0_5 = arith.constant 0 : index
    %3 = vector.load %arg4[%c0_4, %c0_5] : memref<64x1xf32, #tpu.memory_space<vmem>>, vector<64x1xf32>
    %cst = arith.constant dense<0.000000e+00> : vector<64x16xf32>
    %4 = tpu.matmul %2, %1, %cst {dimension_numbers = #tpu.dot_dimension_numbers<[1], [0], [0], [1], [0, 0, 1, 1], [], []>} : vector<64x32xf32>, vector<32x16xf32>, vector<64x16xf32> -> vector<64x16xf32>
    %5 = vector.broadcast %3 : vector<64x1xf32> to vector<64x16xf32>
    %6 = arith.subf %4, %5 : vector<64x16xf32>
    %cst_6 = arith.constant dense<0xFF800000> : vector<16xf32>
    %7 = vector.multi_reduction <maximumf>, %6, %cst_6 [0] : vector<64x16xf32> to vector<16xf32>
    %8 = vector.shape_cast %7 : vector<16xf32> to vector<1x16xf32>
    %9 = tpu.iota {dimensions = array<i32: 0>} : vector<64x16xi32>
    %10 = vector.broadcast %8 : vector<1x16xf32> to vector<64x16xf32>
    %11 = arith.cmpf oeq, %6, %10 : vector<64x16xf32>
    %c64_i32 = arith.constant 64 : i32
    %12 = vector.broadcast %c64_i32 : i32 to vector<64x16xi32>
    %13 = arith.select %11, %9, %12 : vector<64x16xi1>, vector<64x16xi32>
    %cst_7 = arith.constant dense<2147483647> : vector<16xi32>
    %14 = vector.multi_reduction <minsi>, %13, %cst_7 [0] : vector<64x16xi32> to vector<16xi32>
    %15 = vector.shape_cast %14 : vector<16xi32> to vector<1x16xi32>
    %16 = vector.broadcast %15 : vector<1x16xi32> to vector<64x16xi32>
    %17 = arith.cmpi eq, %9, %16 : vector<64x16xi32>
    %18 = arith.extui %17 : vector<64x16xi1> to vector<64x16xi32>
    %19 = arith.sitofp %18 : vector<64x16xi32> to vector<64x16xf32>
    %cst_8 = arith.constant dense<0.000000e+00> : vector<32x16xf32>
    %20 = tpu.matmul %2, %19, %cst_8 {dimension_numbers = #tpu.dot_dimension_numbers<[0], [0], [1], [1], [0, 1, 1, 1], [], []>} : vector<64x32xf32>, vector<64x16xf32>, vector<32x16xf32> -> vector<32x16xf32>
    %c0_9 = arith.constant 0 : index
    %c0_10 = arith.constant 0 : index
    %c0_11 = arith.constant 0 : index
    %21 = vector.load %arg5[%c0_9, %c0_10, %c0_11] : memref<1x32x16xf32, #tpu.memory_space<vmem>>, vector<1x32x16xf32>
    %22 = vector.shape_cast %21 : vector<1x32x16xf32> to vector<32x16xf32>
    %23 = vector.shape_cast %20 : vector<32x16xf32> to vector<1x32x16xf32>
    tpu.vector_store %arg5[%c0_9, %c0_10, %c0_11], %23 {strides = array<i32>} : memref<1x32x16xf32, #tpu.memory_space<vmem>>, vector<1x32x16xf32>,
    %24 = vector.shape_cast %14 : vector<16xi32> to vector<1x16xi32>
    %c0_12 = arith.constant 0 : index
    %c0_13 = arith.constant 0 : index
    %c0_14 = arith.constant 0 : index
    %25 = vector.load %arg6[%c0_12, %c0_13, %c0_14] : memref<1x1x16xi32, #tpu.memory_space<vmem>>, vector<1x1x16xi32>
    %26 = vector.shape_cast %25 : vector<1x1x16xi32> to vector<1x16xi32>
    %27 = vector.shape_cast %24 : vector<1x16xi32> to vector<1x1x16xi32>
    tpu.vector_store %arg6[%c0_12, %c0_13, %c0_14], %27 {strides = array<i32>} : memref<1x1x16xi32, #tpu.memory_space<vmem>>, vector<1x1x16xi32>,
    return
  }
  func.func @transform_0(%arg0: i32, %arg1: i32) -> (i32, i32, i32) {
    %c0_i32 = arith.constant 0 : i32
    %c0_i32_0 = arith.constant 0 : i32
    return %arg0, %c0_i32, %arg1 : i32, i32, i32
  }
  func.func @transform_1(%arg0: i32, %arg1: i32) -> (i32, i32) {
    %c0_i32 = arith.constant 0 : i32
    %c0_i32_0 = arith.constant 0 : i32
    %c0_i32_1 = arith.constant 0 : i32
    return %c0_i32, %c0_i32_0 : i32, i32
  }
  func.func @transform_2(%arg0: i32, %arg1: i32) -> (i32, i32) {
    %c0_i32 = arith.constant 0 : i32
    %c0_i32_0 = arith.constant 0 : i32
    %c0_i32_1 = arith.constant 0 : i32
    return %c0_i32, %c0_i32_0 : i32, i32
  }
  func.func @transform_3(%arg0: i32, %arg1: i32) -> (i32, i32, i32) {
    %c0_i32 = arith.constant 0 : i32
    %c0_i32_0 = arith.constant 0 : i32
    return %arg0, %c0_i32, %arg1 : i32, i32, i32
  }
  func.func @transform_4(%arg0: i32, %arg1: i32) -> (i32, i32, i32) {
    %c0_i32 = arith.constant 0 : i32
    %c0_i32_0 = arith.constant 0 : i32
    return %arg0, %c0_i32, %arg1 : i32, i32, i32
  }
}

</mosaic_0001>

<bundles_post_ra>
// kernel: tpu_custom_call.1
= control target key start
LH: loop header
LB: loop body
LE: loop exit
PB: predicated region body
PF: predicated region fallthrough
CT: control target
= control target key end

     0   :  { %10 = vsyncpa [#allocation3], 0  ;;  %s1131_s0 = inlined_call_operand.vmem [shape: f32[2,32,16], index: 0, kind: input, shape index: {}]   ;;  %s1132_s1 = inlined_call_operand.vmem [shape: f32[64,32], index: 1, kind: input, shape index: {}]   ;;  %s1133_s2 = inlined_call_operand.vmem [shape: f32[64,1], index: 2, kind: input, shape index: {}]   ;;  %s1134_s3 = inlined_call_operand.vmem [shape: f32[2,32,16], index: 3, kind: output, shape index: {0}]   ;;  %s1135_s4 = inlined_call_operand.hbm [shape: s32[2,1,16], index: 4, kind: output, shape index: {1}]  }
   0x1   :  { %12 = vsyncpa [#allocation3 + $0x1], 0  ;;  %s909_s15 = smov 0   ;;  %s911_s16 = smov 0  }
   0x2   :  { %s913_s17 = smov 0   ;;  %s915_s18 = smov 0  }
   0x3   :  { %s917_s19 = smov 0   ;;  %s919_s20 = smov 0  }
   0x4 LB: > { %s688_s21 = sadd.s32 4294967295, %s880_s20   ;;  %s689_s22 = sadd.s32 4294967294, %s880_s20   ;;  %s880_s20 = sphi %s919_s20, %s18_s20   ;;  %s876_s19 = sphi %s917_s19, %s1142_s19   ;;  %s872_s18 = sphi %s915_s18, %s1141_s18   ;;  %s868_s17 = sphi %s913_s17, %s1140_s17   ;;  %s864_s16 = sphi %s911_s16, %s1139_s16   ;;  %s860_s15 = sphi %s909_s15, %s1138_s15  }
   0x5   : > { %s30_s23 = sadd.s32 1, %s876_s19  ;;  %s137_s24 = sadd.s32 1, %s868_s17 }
   0x6   : > { %p32_p0 = scmp.ge.s32.totalorder %s30_s23, 2  ;;  %p147_p1 = scmp.ne.s32.totalorder %s868_s17, %s864_s16 }
   0x7   : > { %p148_p2 = scmp.eq.s32.totalorder %s688_s21, 1  ;;  %p153_p3 = scmp.ne.s32.totalorder %s864_s16, %s860_s15 }
   0x8   : > { %s1144_s23 = smov (%p32_p0, %s30_s23), 0  ;;  %p154_p5 = scmp.eq.s32.totalorder %s689_s22, 1 }
   0x9   : > { %p949_p4 = por %p148_p2, %p147_p1  ;;  %s132_s26 = ssub.s32 %s876_s19, %s1144_s23 }
   0xa   : > { %p692_p6 = scmp.ge.s32.totalorder %s880_s20, 1  ;;  %p135_p7 = scmp.eq.s32.totalorder %s132_s26, 0 }
   0xb   : > { %p956_p8 = por %p154_p5, %p153_p3  ;;  %p189_p9 = scmp.lt.s32.totalorder %s880_s20, 3 }
   0xc   : > { %s962_s28 = scalar_select %p135_p7, %s868_s17, %s137_s24  }
   0xd   : > { %p190_p10 = pnand %p692_p6, %p189_p9 }
   0xe   : > { %p225_p11 = scmp.lt.s32.totalorder (!%p190_p10), %s872_s18, 1  ;;  %s223_s12 = sand.u32 (!%p190_p10), 1, %s864_s16  }
   0xf   : > { %193 = sbr.rel (%p190_p10) target bundleno = 407 (0x197), region = 32  ;;  %s578_s22 = scalar_lea.hbm (!%p190_p10), %s1135_s4, %s872_s18 }
  0x10   : > { %s582_s26 = sshll.u32 (!%p190_p10), %s578_s22, 4  ;;  %s566_s29 = scalar_lea.sflag (!%p190_p10), [#allocation3], %s223_s12  ;;  %s583_s26 = int_to_ptr.hbm [resolvable:$true] %s582_s26 }
  0x11   : > { %s816_s30 = sshra.s32 (!%p190_p10), %s583_s26, 4  ;;  %s822_s9 = scalar_lea.hbm (!%p190_p10), %s1135_s4, 2  ;;  %s817_s30 = int_to_ptr.hbm [resolvable:$true] %s816_s30 }
  0x12   : > { %s818_s5 = scalar_lea.hbm (!%p190_p10), %s817_s30, 1  ;;  %p823_p1 = scmp.lt.s32.totalorder (!%p190_p10), %s817_s30, %s1135_s4 }
  0x13   : > { %p819_p12 = scmp.ne.s32.totalorder (!%p190_p10), %s817_s30, %s818_s5  ;;  %p824_p2 = scmp.lt.s32.totalorder (!%p190_p10), %s822_s9, %s818_s5 }
  0x14   : > { %v257_v0 = vld [vmem:[%s1133_s2 + $0x20] sm:$0xff]  ;;  %v882_v1 = vmov 0   ;;  %v255_v2 = vld [vmem:[%s1133_s2 + $0x10] sm:$0xff]  ;;  %s972_s7 = scalar_select %p225_p11, %s872_s18, 1  ;;  %v258_v6 = vld [vmem:[%s1133_s2 + $0x28] sm:$0xff]  ;;  %vm261_vm0 = vcmask 261120   ;;  %v397_v62 = vlaneseq }
  0x15   : > { %801 = vset.pattern.permute.xlu2 %v882_v1  ;;  %800 = vset.pattern.permute.xlu1 %v882_v1  ;;  %v253_v3 = vld [vmem:[%s1133_s2] sm:$0xff]  ;;  %v256_v7 = vld [vmem:[%s1133_s2 + $0x18] sm:$0xff]  ;;  %v254_v9 = vld [vmem:[%s1133_s2 + $0x8] sm:$0xff]  ;;  %vm375_vm1 = vcmask 130048   ;;  %p820_p13 = pnand %p819_p12, %p949_p4  ;;  %p825_p3 = por %p824_p2, %p823_p1 }
  0x16   : > { %349 = vperm.xlu2 %801, %v257_v0   ;;  %339 = vperm.xlu1 %800, %v255_v2   ;;  %s727_s10 = sshll.u32 %s972_s7, 5  ;;  %v248_v11 = vld [vmem:[%s1132_s1 + $0x18] sm:$0xff]  ;;  %v245_v12 = vld [vmem:[%s1132_s1] sm:$0xff]  ;;  %v259_v14 = vld [vmem:[%s1133_s2 + $0x30] sm:$0xff] }
  0x17   : > { %799 = vset.pattern.permute.xlu0 %v882_v1  ;;  %s232_s13 = scalar_lea.vmem %s1131_s0, %s727_s10  ;;  %v260_v13 = vld [vmem:[%s1133_s2 + $0x38] sm:$0xff]  ;;  %v249_v15 = vld [vmem:[%s1132_s1 + $0x20] sm:$0xff]  ;;  %v246_v16 = vld [vmem:[%s1132_s1 + $0x8] sm:$0xff]  ;;  %v1038_v1 = vshrl.u32 %v397_v62, 7  ;;  %p821_p0 = pneg %p820_p13 }
  0x18   : > { %329 = vperm.xlu0 %799, %v253_v3   ;;  %v244_v4 = vld [vmem:[%s232_s13 + $0x18] sm:$0xff]  ;;  %v243_v5 = vld [vmem:[%s232_s13 + $0x10] sm:$0xff]  ;;  %v242_v8 = vld [vmem:[%s232_s13 + $0x8] sm:$0xff] }
  0x19   : > { %729 = vmatpush.msra.mxu2 %v244_v4  ;;  %298 = vmatpush.msra.mxu0 %v244_v4  ;;  %v241_v10 = vld [vmem:[%s232_s13] sm:$0xff]  ;;  %v250_v17 = vld [vmem:[%s1132_s1 + $0x28] sm:$0xff]  ;;  %v247_v18 = vld [vmem:[%s1132_s1 + $0x10] sm:$0xff]  ;;  %v1041_v4 = vadd.s32 8, %v1038_v1  ;;  %s1074_s13 = scalar_lea.vmem [#allocation2], %s223_s12  ;;  %p826_p5 = pnand %p825_p3, %p821_p0 }
  0x1a   : > { %v251_v19 = vld [vmem:[%s1132_s1 + $0x30] sm:$0xff]  ;;  %v252_v20 = vld [vmem:[%s1132_s1 + $0x38] sm:$0xff]  ;;  %s580_s24 = sshll.u32 %s1074_s13, 4  ;;  %s581_s24 = int_to_ptr.vmem [resolvable:$true] %s580_s24 }
  0x1b   : > { %730 = vmatpush.msra.mxu2 %v243_v5  ;;  %299 = vmatpush.msra.mxu0 %v243_v5  ;;  %v1044_v5 = vadd.s32 16, %v1038_v1 }
  0x1d   : > { %731 = vmatpush.msra.mxu2 %v242_v8  ;;  %300 = vmatpush.msra.mxu0 %v242_v8  ;;  %v1053_v8 = vadd.s32 40, %v1038_v1 }
  0x1e   : > { %354 = vperm.xlu2 %801, %v258_v6   ;;  %344 = vperm.xlu1 %800, %v256_v7   ;;  %v1047_v6 = vadd.s32 24, %v1038_v1  ;;  %v1050_v7 = vadd.s32 32, %v1038_v1 }
  0x1f   : > { %732 = vmatpush.msra.mxu2 %v241_v10  ;;  %301 = vmatpush.msra.mxu0 %v241_v10  ;;  %v405_v10 = vadd.s32 56, %v1038_v1 }
  0x20   : > { %334 = vperm.xlu0 %799, %v254_v9   ;;  %700 = vmatmul.msk.f32.vlgmr.msra.gmra.mxu2 %vm261_vm0, %v248_v11  ;;  %v404_v9 = vadd.s32 48, %v1038_v1 }
  0x21   : > { %697 = vmatmul.msk.f32.vlgmr.msra.gmra.mxu0 %vm261_vm0, %v245_v12 }
  0x26   : > { %364 = vperm.xlu1 %800, %v260_v13  }
  0x28   : > { %359 = vperm.xlu0 %799, %v259_v14   ;;  %701 = vmatmul.msk.f32.gmra.mxu2 %vm261_vm0, %v249_v15 }
  0x29   : > { %698 = vmatmul.msk.f32.gmra.mxu0 %vm261_vm0, %v246_v16 }
  0x30   : > { %702 = vmatmul.msk.f32.gmra.mxu2 %vm261_vm0, %v250_v17 }
  0x31   : > { %699 = vmatmul.msk.f32.gmra.mxu0 %vm261_vm0, %v247_v18 }
  0x38   : > { %703 = vmatmul.msk.f32.gmra.mxu2 %vm261_vm0, %v251_v19 }
  0x40   : > { %704 = vmatmul.msk.f32.gmra.mxu2 %vm261_vm0, %v252_v20 }
  0x44   : > { %477 = vxpose.xlu2.b32.start [1/8] (short) (narrow) %v245_v12, 32 }
  0x4c   : > { %478 = vxpose.xlu2.b32.cont [2/8] (short) (narrow) %v246_v16, 32 }
  0x54   : > { %479 = vxpose.xlu2.b32.cont [3/8] (short) (narrow) %v247_v18, 32 }
  0x5c   : > { %480 = vxpose.xlu2.b32.cont [4/8] (short) (narrow) %v248_v11, 32 }
  0x64   : > { %481 = vxpose.xlu2.b32.cont [5/8] (short) (narrow) %v249_v15, 32 }
  0x6c   : > { %482 = vxpose.xlu2.b32.cont [6/8] (short) (narrow) %v250_v17, 32 }
  0x70   : > { %v350_v26 = vpop.permute.xlu2 %349 }
  0x74   : > { %483 = vxpose.xlu2.b32.cont [7/8] (short) (narrow) %v251_v19, 32 }
  0x78   : > { %v355_v32 = vpop.permute.xlu2 %354 }
  0x7c   : > { %484 = vxpose.xlu2.b32.end [8/8] (short) (narrow) %v252_v20, 32 }
  0x88   : > { %v340_v25 = vpop.permute.xlu1 %339 }
  0x8a   : > { %v330_v22 = vpop.permute.xlu0 %329 }
  0x90   : > { %v345_v30 = vpop.permute.xlu1 %344 }
  0x92   : > { %v335_v28 = vpop.permute.xlu0 %334 }
  0x98   : > { %v365_v44 = vpop.permute.xlu1 %364 }
  0x9a   : > { %v360_v35 = vpop.permute.xlu0 %359 }
  0x9e   : > { %v303_v23 = vpop.f32.mrf.mxu0 }
  0x9f   : > { %v367_v37 = vsub.f32 %v303_v23, %v330_v22 }
  0xa1   : > { %v376_v46 = vsel %vm375_vm1, %v367_v37, -inf }
  0xa3   : > { %v312_v21 = vpop.f32.mrf.mxu2 }
  0xa4   : > { %v370_v40 = vsub.f32 %v312_v21, %v345_v30 }
  0xa6   : > { %v306_v29 = vpop.f32.mrf.mxu0  ;;  %v379_v51 = vsel %vm375_vm1, %v370_v40, -inf }
  0xa7   : > { %v368_v33 = vsub.f32 %v306_v29, %v335_v28 }
  0xa9   : > { %v377_v41 = vsel %vm375_vm1, %v368_v33, -inf }
  0xab   : > { %v315_v24 = vpop.f32.mrf.mxu2 }
  0xac   : > { %v371_v38 = vsub.f32 %v315_v24, %v350_v26 }
  0xae   : > { %v309_v36 = vpop.f32.mrf.mxu0  ;;  %v380_v47 = vsel %vm375_vm1, %v371_v38, -inf }
  0xaf   : > { %v369_v42 = vsub.f32 %v309_v36, %v340_v25  ;;  %v381_v54 = vmax.f32 %v376_v46, %v380_v47 }
  0xb1   : > { %v378_v52 = vsel %vm375_vm1, %v369_v42, -inf }
  0xb3   : > { %v318_v27 = vpop.f32.mrf.mxu2 }
  0xb4   : > { %v372_v34 = vsub.f32 %v318_v27, %v355_v32 }
  0xb6   : > { %v382_v43 = vsel %vm375_vm1, %v372_v34, -inf }
  0xb7   : > { %v383_v50 = vmax.f32 %v377_v41, %v382_v43  ;;  %v883_v41 = vmov 1.0  }
  0xb9   : > { %v388_v57 = vmax.f32 %v381_v54, %v383_v50 }
  0xbb   : > { %v321_v31 = vpop.f32.mrf.mxu2 }
  0xbc   : > { %v373_v39 = vsub.f32 %v321_v31, %v360_v35 }
  0xbe   : > { %v384_v48 = vsel %vm375_vm1, %v373_v39, -inf }
  0xbf   : > { %v385_v55 = vmax.f32 %v378_v52, %v384_v48 }
  0xc3   : > { %v324_v45 = vpop.f32.mrf.mxu2 }
  0xc4   : > { %v374_v49 = vsub.f32 %v324_v45, %v365_v44 }
  0xc6   : > { %v386_v53 = vsel %vm375_vm1, %v374_v49, -inf }
  0xc7   : > { %v387_v56 = vmax.f32 %v379_v51, %v386_v53 }
  0xc9   : > { %v389_v58 = vmax.f32 %v385_v55, %v387_v56 }
  0xcb   : > { %v390_v59 = vmax.f32 %v388_v57, %v389_v58 }
  0xcd   : > { %v391_v60 = vrot.slane %v390_v59, 4 }
  0xcf   : > { %v392_v61 = vmax.f32 %v390_v59, %v391_v60 }
  0xd1   : > { %v393_v63 = vrot.slane %v392_v61, 2 }
  0xd3   : > { %v394_v0 = vmax.f32 %v392_v61, %v393_v63 }
  0xd5   : > { %v395_v2 = vrot.slane %v394_v0, 1 }
  0xd7   : > { %v396_v3 = vmax.f32 %v394_v0, %v395_v2 }
  0xd9   : > { %vm413_vm2 = vcmp.eq.f32.partialorder %v374_v49, %v396_v3  ;;  %vm406_vm3 = vcmp.eq.f32.partialorder %v367_v37, %v396_v3  ;;  %vm407_vm4 = vcmp.eq.f32.partialorder %v368_v33, %v396_v3  ;;  %vm408_vm5 = vcmp.eq.f32.partialorder %v369_v42, %v396_v3 }
  0xda   : > { %vm409_vm6 = vcmp.eq.f32.partialorder %v370_v40, %v396_v3  ;;  %vm410_vm7 = vcmp.eq.f32.partialorder %v371_v38, %v396_v3  ;;  %vm411_vm8 = vcmp.eq.f32.partialorder %v372_v34, %v396_v3  ;;  %vm412_vm9 = vcmp.eq.f32.partialorder %v373_v39, %v396_v3 }
  0xdb   : > { %v414_v11 = vsel %vm406_vm3, %v1038_v1, 64  ;;  %v415_v12 = vsel %vm407_vm4, %v1041_v4, 64  ;;  %v416_v13 = vsel %vm408_vm5, %v1044_v5, 64  ;;  %v417_v14 = vsel %vm409_vm6, %v1047_v6, 64 }
  0xdc   : > { %v418_v15 = vsel %vm410_vm7, %v1050_v7, 64  ;;  %v419_v16 = vsel %vm411_vm8, %v1053_v8, 64  ;;  %v420_v17 = vsel %vm412_vm9, %v404_v9, 64  ;;  %v421_v18 = vsel %vm413_vm2, %v405_v10, 64 }
  0xdd   : > { %v422_v19 = vsel %vm375_vm1, %v414_v11, 2147483647  ;;  %v423_v20 = vsel %vm375_vm1, %v415_v12, 2147483647  ;;  %v424_v21 = vsel %vm375_vm1, %v416_v13, 2147483647  ;;  %v493_v40 = vpop.trf.xlu2 }
  0xde   : > { %v425_v22 = vsel %vm375_vm1, %v417_v14, 2147483647  ;;  %v426_v23 = vsel %vm375_vm1, %v418_v15, 2147483647  ;;  %v429_v24 = vsel %vm375_vm1, %v419_v16, 2147483647 }
  0xdf   : > { %vm427_vm10 = vcmp.lt.s32.totalorder %v422_v19, %v426_v23  ;;  %vm430_vm11 = vcmp.lt.s32.totalorder %v423_v20, %v429_v24  ;;  %v432_v25 = vsel %vm375_vm1, %v420_v17, 2147483647  ;;  %v435_v26 = vsel %vm375_vm1, %v421_v18, 2147483647 }
  0xe0   : > { %v428_v27 = vsel %vm427_vm10, %v422_v19, %v426_v23  ;;  %v431_v28 = vsel %vm430_vm11, %v423_v20, %v429_v24  ;;  %vm433_vm12 = vcmp.lt.s32.totalorder %v424_v21, %v432_v25  ;;  %vm436_vm13 = vcmp.lt.s32.totalorder %v425_v22, %v435_v26 }
  0xe1   : > { %v434_v29 = vsel %vm433_vm12, %v424_v21, %v432_v25  ;;  %v437_v30 = vsel %vm436_vm13, %v425_v22, %v435_v26  ;;  %vm438_vm14 = vcmp.lt.s32.totalorder %v428_v27, %v431_v28  ;;  %vm555_vm4 = vcmask 122880  }
  0xe2   : > { %v439_v31 = vsel %vm438_vm14, %v428_v27, %v431_v28  ;;  %vm440_vm15 = vcmp.lt.s32.totalorder %v434_v29, %v437_v30  ;;  %vm509_vm13 = vcmask 523264  }
  0xe3   : > { %v441_v32 = vsel %vm440_vm15, %v434_v29, %v437_v30 }
  0xe4   : > { %vm442_vm0 = vcmp.lt.s32.totalorder %v439_v31, %v441_v32 }
  0xe5   : > { %v443_v33 = vsel %vm442_vm0, %v439_v31, %v441_v32  ;;  %v494_v42 = vpop.trf.xlu2 }
  0xe6   : > { %v444_v34 = vrot.slane %v443_v33, 4 }
  0xe8   : > { %vm445_vm2 = vcmp.lt.s32.totalorder %v443_v33, %v444_v34 }
  0xe9   : > { %v446_v35 = vsel %vm445_vm2, %v443_v33, %v444_v34 }
  0xea   : > { %v447_v36 = vrot.slane %v446_v35, 2 }
  0xec   : > { %vm448_vm3 = vcmp.lt.s32.totalorder %v446_v35, %v447_v36 }
  0xed   : > { %v449_v37 = vsel %vm448_vm3, %v446_v35, %v447_v36  ;;  %v495_v43 = vpop.trf.xlu2 }
  0xee   : > { %v450_v38 = vrot.slane %v449_v37, 1 }
  0xf0   : > { %vm451_vm5 = vcmp.lt.s32.totalorder %v449_v37, %v450_v38 }
  0xf1   : > { %v452_v39 = vsel %vm451_vm5, %v449_v37, %v450_v38 }
  0xf2   : > { %vm460_vm6 = vcmp.eq.s32.totalorder %v405_v10, %v452_v39  ;;  %556 = vst.msk [vmem:[%s1074_s13] sm:$0x1] %vm555_vm4, %v452_v39  ;;  %vm459_vm7 = vcmp.eq.s32.totalorder %v404_v9, %v452_v39  ;;  %vm458_vm8 = vcmp.eq.s32.totalorder %v1053_v8, %v452_v39  ;;  %vm457_vm9 = vcmp.eq.s32.totalorder %v1050_v7, %v452_v39 }
  0xf3   : > { %713 = vmatpush.msk.msra.mxu1 %vm460_vm6, %v883_v41  ;;  %733 = vmatpush.msk.msra.mxu3 %vm460_vm6, %v883_v41  ;;  %vm456_vm10 = vcmp.eq.s32.totalorder %v1047_v6, %v452_v39  ;;  %vm455_vm11 = vcmp.eq.s32.totalorder %v1044_v5, %v452_v39  ;;  %vm454_vm12 = vcmp.eq.s32.totalorder %v1041_v4, %v452_v39 }
  0xf4   : > { %vm453_vm14 = vcmp.eq.s32.totalorder %v1038_v1, %v452_v39 }
  0xf5   : > { %714 = vmatpush.msk.msra.mxu1 %vm459_vm7, %v883_v41  ;;  %734 = vmatpush.msk.msra.mxu3 %vm459_vm7, %v883_v41  ;;  %v496_v44 = vpop.trf.xlu2 }
  0xf7   : > { %715 = vmatpush.msk.msra.mxu1 %vm458_vm8, %v883_v41  ;;  %735 = vmatpush.msk.msra.mxu3 %vm458_vm8, %v883_v41 }
  0xf9   : > { %716 = vmatpush.msk.msra.mxu1 %vm457_vm9, %v883_v41  ;;  %736 = vmatpush.msk.msra.mxu3 %vm457_vm9, %v883_v41 }
  0xfb   : > { %717 = vmatpush.msk.msra.mxu1 %vm456_vm10, %v883_v41  ;;  %737 = vmatpush.msk.msra.mxu3 %vm456_vm10, %v883_v41 }
  0xfd   : > { %718 = vmatpush.msk.msra.mxu1 %vm455_vm11, %v883_v41  ;;  %738 = vmatpush.msk.msra.mxu3 %vm455_vm11, %v883_v41 }
  0xff   : > { %719 = vmatpush.msk.msra.mxu1 %vm454_vm12, %v883_v41  ;;  %739 = vmatpush.msk.msra.mxu3 %vm454_vm12, %v883_v41 }
 0x101   : > { %720 = vmatpush.msk.msra.mxu1 %vm453_vm14, %v883_v41  ;;  %740 = vmatpush.msk.msra.mxu3 %vm453_vm14, %v883_v41 }
 0x102   : > { %721 = vmatmul.msk.f32.vlgmr.msra.gmra.mxu1 %vm509_vm13, %v493_v40  ;;  %722 = vmatmul.msk.f32.vlgmr.msra.gmra.mxu3 %vm509_vm13, %v494_v42 }
 0x10a   : > { %723 = vmatmul.msk.f32.gmra.mxu3 %vm509_vm13, %v495_v43 }
 0x112   : > { %724 = vmatmul.msk.f32.gmra.mxu3 %vm509_vm13, %v496_v44 }
 0x113   : > { %829 = shalt.err (!%p826_p5)
}
 0x114   : > { %741 = dma.vmem_to_hbm [thread:$0]  (%p949_p4), %s581_s24, 16, %s583_s26, %s566_s29  }
 0x115   : > { %s240_s13 = scalar_lea.vmem %s1134_s3, %s727_s10 }
 0x17f   : > { %v539_v45 = vpop.f32.mrf.mxu1 }
 0x180   : > { %551 = vst.msk [vmem:[%s240_s13] sm:$0xff] %vm375_vm1, %v539_v45 }
 0x185   : > { %v542_v46 = vpop.f32.mrf.mxu3 }
 0x186   : > { %552 = vst.msk [vmem:[%s240_s13 + $0x8] sm:$0xff] %vm375_vm1, %v542_v46 }
 0x18d   : > { %v545_v47 = vpop.f32.mrf.mxu3 }
 0x18e   : > { %553 = vst.msk [vmem:[%s240_s13 + $0x10] sm:$0xff] %vm375_vm1, %v545_v47 }
 0x195   : > { %v548_v48 = vpop.f32.mrf.mxu3 }
 0x196   : > { %554 = vst.msk [vmem:[%s240_s13 + $0x18] sm:$0xff] %vm375_vm1, %v548_v48 }
 0x197 PF: > { %p747_p4 = scmp.ge.s32.totalorder %s880_s20, 2  ;;  %s605_s25 = sand.u32 1, %s860_s15  }
 0x198   : > { %s606_s7 = scalar_lea.sflag [#allocation3], %s605_s25 }
 0x199   : > { %p744_p6 = pnand %p747_p4, %p956_p8 }
 0x19b   : > { %p745_p7 = pneg %p744_p6 }
 0x19d   : > { %855 = dma.done.wait (%p745_p7), %s606_s7, 16  }
 0x19e   : > { %857 = vsyncadd (%p745_p7), %s606_s7, 4294967280  ;;  %s18_s20 = sadd.s32 1, %s880_s20   ;;  %s1138_s15 = smov %s864_s16 }
 0x19f   : > { %p15_p9 = scmp.ge.s32.totalorder %s18_s20, 4   ;;  %s1139_s16 = smov %s868_s17 }
 0x1a0   : > { %s1140_s17 = smov %s962_s28  ;;  %s1141_s18 = smov %s876_s19 }
 0x1a1   : > { %s1142_s19 = smov %s1144_s23  ;;  %17 = sbr.rel (!%p15_p9) target bundleno = 4 (0x4), region = 79 }
 0x1a6   :  { %611 = vsyncpa [#allocation3], 1 }
 0x1a7   :  { %613 = vsyncpa [#allocation3 + $0x1], 1 }

</bundles_post_ra>
